<compile_context>
chip_gen: v6e
topology: v6e:2x2x1
jax: 0.10.0
libtpu: 0.0.40
codegen_flags: <defaults>
</compile_context>

<pallas_src>
import functools

import jax
import jax.numpy as jnp
from jax.experimental import pallas as pl
from jax.experimental.pallas import tpu as pltpu


def _gated_tcn_kernel(x_ref, w_ref, b_ref, o_ref, *,
                      dilation: int, kernel_size: int, c_out: int):
    # x_ref : (B_blk, C_in, L)       NCL batch block (L on the lane axis)
    # w_ref : (2*C_out, K*C_in)      fused [filter; gate] weights, tap-major cols
    # b_ref : (2*C_out, 1)           fused bias, broadcast over lanes
    # o_ref : (B_blk, C_out, L_out)  NCL output block (lane-dense: L_out on lanes)
    b_blk = x_ref.shape[0]
    l_out = o_ref.shape[2]

    w = w_ref[...]                   # weights/bias stay resident across the loop
    bias = b_ref[...]                # (2*C_out, 1)

    for b in range(b_blk):           # static unroll; B_blk is kept small
        xb = x_ref[b]                # (C_in, L)
        # im2col over the K dilated taps: row order = [tap0 C_in rows, tap1 ...]
        x_cat = jnp.concatenate(
            [xb[:, k * dilation: k * dilation + l_out]
             for k in range(kernel_size)],
            axis=0)                  # (K*C_in, L_out)
        # One fused MXU matmul covering both the filter and gate branches.
        acc = jnp.dot(w, x_cat, preferred_element_type=jnp.float32) + bias
        f = acc[:c_out, :]
        g = acc[c_out:, :]
        o_ref[b] = (jnp.tanh(f) * jax.nn.sigmoid(g)).astype(o_ref.dtype)


def _pick_batch_block(n, c_in, l, c_out, l_out, itemsize):
    """Largest divisor of n that keeps per-step tiles modest and the grid >= 2."""
    per_elem_bytes = (c_in * l + c_out * l_out) * itemsize
    target = max(1, (4 * 1024 * 1024) // max(per_elem_bytes, 1))
    target = min(target, 8)          # bounds the in-kernel unroll / vreg pressure
    if n >= 2:
        target = min(target, n // 2)  # keep >= 2 grid steps (v7x megacore sharding)
    b = max(1, target)
    while n % b:
        b -= 1
    return b


def gated_tcn(x_ncl, wf, bf, wg, bg, *, dilation: int = 1, batch_block=None):
    """x_ncl: (N, C_in, L); wf/wg: (C_out, C_in, K); bf/bg: (C_out,). NCL in/out."""
    n, c_in, l = x_ncl.shape
    c_out, _, k = wf.shape
    l_out = l - dilation * (k - 1)
    assert l_out >= 1, "sequence too short for this kernel_size/dilation"

    # Fuse filter+gate along the output-channel axis; reorder weight columns so
    # column index (tap * C_in + c) matches the in-kernel im2col row order.
    w_fused = jnp.concatenate([wf, wg], axis=0)                    # (2*C_out, C_in, K)
    w_fused = jnp.transpose(w_fused, (0, 2, 1)).reshape(2 * c_out, k * c_in)
    b_fused = jnp.concatenate([bf, bg], axis=0).reshape(2 * c_out, 1)
    # (For v6e/v7x, cast x_ncl / w_fused to bfloat16 here if reduced-precision
    #  matmul inputs are acceptable; accumulation stays f32 either way.)

    if batch_block is None:
        batch_block = _pick_batch_block(n, c_in, l, c_out, l_out,
                                        jnp.dtype(x_ncl.dtype).itemsize)
    assert n % batch_block == 0
    grid = (n // batch_block,)

    kernel = functools.partial(_gated_tcn_kernel, dilation=dilation,
                               kernel_size=k, c_out=c_out)

    return pl.pallas_call(
        kernel,
        out_shape=jax.ShapeDtypeStruct((n, c_out, l_out), x_ncl.dtype),
        grid_spec=pltpu.PrefetchScalarGridSpec(
            num_scalar_prefetch=0,
            grid=grid,
            in_specs=[
                pl.BlockSpec((batch_block, c_in, l), lambda i: (i, 0, 0)),
                pl.BlockSpec((2 * c_out, k * c_in), lambda i: (0, 0)),
                pl.BlockSpec((2 * c_out, 1), lambda i: (0, 0)),
            ],
            out_specs=pl.BlockSpec((batch_block, c_out, l_out),
                                   lambda i: (i, 0, 0)),
        ),
        compiler_params=pltpu.CompilerParams(
            dimension_semantics=("parallel",)),
    )(x_ncl, w_fused, b_fused)


def _reference(x_ncl, wf, bf, wg, bg, *, dilation: int = 1):
    """Pure-JAX reference of the PyTorch forward (for correctness check)."""
    n, c_in, l = x_ncl.shape
    c_out, _, k = wf.shape
    l_out = l - dilation * (k - 1)

    def conv1d(w, b):
        acc = jnp.zeros((n, c_out, l_out), jnp.float32)
        for kk in range(k):
            xs = x_ncl[:, :, kk * dilation: kk * dilation + l_out]  # (N,C_in,L_out)
            acc = acc + jnp.einsum('ncl,oc->nol', xs, w[:, :, kk])
        return acc + b[None, :, None]

    f = conv1d(wf, bf)
    g = conv1d(wg, bg)
    return (jnp.tanh(f) * jax.nn.sigmoid(g)).astype(x_ncl.dtype)


if __name__ == "__main__":
    def _run_case(case_key, n, c_in, c_out, l, k, dil):
        kx, kwf, kbf, kwg, kbg = jax.random.split(case_key, 5)
        # Deterministic "init" mimicking PyTorch Conv1d uniform(+-1/sqrt(fan_in)).
        bound = 1.0 / (c_in * k) ** 0.5
        x = jax.random.normal(kx, (n, c_in, l), jnp.float32)
        wf = jax.random.uniform(kwf, (c_out, c_in, k), jnp.float32, -bound, bound)
        bf = jax.random.uniform(kbf, (c_out,), jnp.float32, -bound, bound)
        wg = jax.random.uniform(kwg, (c_out, c_in, k), jnp.float32, -bound, bound)
        bg = jax.random.uniform(kbg, (c_out,), jnp.float32, -bound, bound)

        out = jax.block_until_ready(gated_tcn(x, wf, bf, wg, bg, dilation=dil))
        ref = _reference(x, wf, bf, wg, bg, dilation=dil)
        assert out.shape == (n, c_out, l - dil * (k - 1)), out.shape
        assert jnp.allclose(out, ref, atol=1e-5, rtol=1e-5), \
            float(jnp.max(jnp.abs(out - ref)))

    key = jax.random.PRNGKey(0)
    k0, k1 = jax.random.split(key)
    # Small shapes consistent with the module's (N, C, L) Conv1d input.
    _run_case(k0, n=2, c_in=4, c_out=8, l=16, k=2, dil=1)
    _run_case(k1, n=4, c_in=8, c_out=8, l=24, k=2, dil=2)
    print("KERNEL_OK")
</pallas_src>

<mosaic_0001>
module attributes {stable_mosaic.version = 11 : i64} {
  func.func @_gated_tcn_kernel(%arg0: i32, %arg1: memref<1x4x16xf32, #tpu.memory_space<vmem>>, %arg2: memref<16x8xf32, #tpu.memory_space<vmem>>, %arg3: memref<16x1xf32, #tpu.memory_space<vmem>>, %arg4: memref<1x8x15xf32, #tpu.memory_space<vmem>>) attributes {dimension_semantics = [#tpu.dimension_semantics<parallel>], iteration_bounds = array<i64: 2>, scalar_prefetch = 0 : i64, scratch_operands = 0 : i64, tpu.core_type = #tpu.core_type<tc>, window_params = [{transform_indices = @transform_0, window_bounds = array<i64: 1, 4, 16>}, {pipeline_mode = #tpu.pipeline_mode<synchronous>, transform_indices = @transform_1, window_bounds = array<i64: 16, 8>}, {pipeline_mode = #tpu.pipeline_mode<synchronous>, transform_indices = @transform_2, window_bounds = array<i64: 16, 1>}, {transform_indices = @transform_3, window_bounds = array<i64: 1, 8, 15>}]} {
    %c0 = arith.constant 0 : index
    %c0_0 = arith.constant 0 : index
    %0 = vector.load %arg2[%c0, %c0_0] : memref<16x8xf32, #tpu.memory_space<vmem>>, vector<16x8xf32>
    %c0_1 = arith.constant 0 : index
    %c0_2 = arith.constant 0 : index
    %1 = vector.load %arg3[%c0_1, %c0_2] : memref<16x1xf32, #tpu.memory_space<vmem>>, vector<16x1xf32>
    %c0_3 = arith.constant 0 : index
    %c0_4 = arith.constant 0 : index
    %c0_5 = arith.constant 0 : index
    %2 = vector.load %arg1[%c0_3, %c0_4, %c0_5] : memref<1x4x16xf32, #tpu.memory_space<vmem>>, vector<1x4x16xf32>
    %3 = vector.shape_cast %2 : vector<1x4x16xf32> to vector<4x16xf32>
    %4 = vector.extract_strided_slice %3 {offsets = [0, 0], sizes = [4, 15], strides = [1, 1]} : vector<4x16xf32> to vector<4x15xf32>
    %5 = vector.extract_strided_slice %3 {offsets = [0, 1], sizes = [4, 15], strides = [1, 1]} : vector<4x16xf32> to vector<4x15xf32>
    %6 = tpu.concatenate %4, %5 in 0 : vector<4x15xf32>, vector<4x15xf32> -> vector<8x15xf32>
    %cst = arith.constant dense<0.000000e+00> : vector<16x15xf32>
    %7 = tpu.matmul %0, %6, %cst {dimension_numbers = #tpu.dot_dimension_numbers<[1], [0], [0], [1], [0, 0, 1, 1], [], []>} : vector<16x8xf32>, vector<8x15xf32>, vector<16x15xf32> -> vector<16x15xf32>
    %8 = vector.broadcast %1 : vector<16x1xf32> to vector<16x15xf32>
    %9 = arith.addf %7, %8 : vector<16x15xf32>
    %10 = vector.extract_strided_slice %9 {offsets = [0, 0], sizes = [8, 15], strides = [1, 1]} : vector<16x15xf32> to vector<8x15xf32>
    %11 = vector.extract_strided_slice %9 {offsets = [8, 0], sizes = [8, 15], strides = [1, 1]} : vector<16x15xf32> to vector<8x15xf32>
    %12 = math.tanh %10 : vector<8x15xf32>
    %13 = arith.negf %11 : vector<8x15xf32>
    %14 = math.exp %13 : vector<8x15xf32>
    %cst_6 = arith.constant 1.000000e+00 : f32
    %15 = vector.broadcast %cst_6 : f32 to vector<8x15xf32>
    %16 = arith.addf %15, %14 : vector<8x15xf32>
    %17 = arith.divf %15, %16 : vector<8x15xf32>
    %18 = arith.mulf %12, %17 : vector<8x15xf32>
    %c0_7 = arith.constant 0 : index
    %c0_8 = arith.constant 0 : index
    %c0_9 = arith.constant 0 : index
    %19 = vector.load %arg4[%c0_7, %c0_8, %c0_9] : memref<1x8x15xf32, #tpu.memory_space<vmem>>, vector<1x8x15xf32>
    %20 = vector.shape_cast %19 : vector<1x8x15xf32> to vector<8x15xf32>
    %21 = vector.shape_cast %18 : vector<8x15xf32> to vector<1x8x15xf32>
    tpu.vector_store %arg4[%c0_7, %c0_8, %c0_9], %21 {strides = array<i32>} : memref<1x8x15xf32, #tpu.memory_space<vmem>>, vector<1x8x15xf32>,
    return
  }
  func.func @transform_0(%arg0: i32) -> (i32, i32, i32) {
    %c0_i32 = arith.constant 0 : i32
    %c0_i32_0 = arith.constant 0 : i32
    %c0_i32_1 = arith.constant 0 : i32
    return %arg0, %c0_i32, %c0_i32_0 : i32, i32, i32
  }
  func.func @transform_1(%arg0: i32) -> (i32, i32) {
    %c0_i32 = arith.constant 0 : i32
    %c0_i32_0 = arith.constant 0 : i32
    %c0_i32_1 = arith.constant 0 : i32
    return %c0_i32, %c0_i32_0 : i32, i32
  }
  func.func @transform_2(%arg0: i32) -> (i32, i32) {
    %c0_i32 = arith.constant 0 : i32
    %c0_i32_0 = arith.constant 0 : i32
    %c0_i32_1 = arith.constant 0 : i32
    return %c0_i32, %c0_i32_0 : i32, i32
  }
  func.func @transform_3(%arg0: i32) -> (i32, i32, i32) {
    %c0_i32 = arith.constant 0 : i32
    %c0_i32_0 = arith.constant 0 : i32
    %c0_i32_1 = arith.constant 0 : i32
    return %arg0, %c0_i32, %c0_i32_0 : i32, i32, i32
  }
}

</mosaic_0001>

<bundles_post_ra>
// kernel: tpu_custom_call.1
= control target key start
LH: loop header
LB: loop body
LE: loop exit
PB: predicated region body
PF: predicated region fallthrough
CT: control target
= control target key end

     0   :  { %8 = vsyncpa [#allocation3], 0  ;;  %s609_s0 = inlined_call_operand.vmem [shape: f32[2,4,16], index: 0, kind: input, shape index: {}]   ;;  %s610_s1 = inlined_call_operand.vmem [shape: f32[16,8], index: 1, kind: input, shape index: {}]   ;;  %s611_s2 = inlined_call_operand.vmem [shape: f32[16,1], index: 2, kind: input, shape index: {}]   ;;  %s612_s3 = inlined_call_operand.hbm [shape: f32[2,8,15], index: 3, kind: output, shape index: {}]  }
   0x1   :  { %10 = vsyncpa [#allocation3 + $0x1], 0  ;;  %s508_s12 = smov 0   ;;  %s510_s13 = smov 0  }
   0x2   :  { %s512_s14 = smov 0   ;;  %s514_s15 = smov 0  }
   0x3 LB: > { %s529_s16 = sadd.s32 4294967295, %s483_s15   ;;  %s353_s17 = sadd.s32 4294967294, %s483_s15   ;;  %s483_s15 = sphi %s514_s15, %s618_s15   ;;  %s479_s14 = sphi %s512_s14, %s617_s14   ;;  %s475_s13 = sphi %s510_s13, %s616_s13   ;;  %s471_s12 = sphi %s508_s12, %s615_s12  }
   0x4   : > { %s533_s18 = sadd.s32 1, %s483_s15   ;;  %s91_s19 = sadd.s32 1, %s479_s14 }
   0x5   : > { %s88_s20 = ssub.s32 %s483_s15, %s533_s18  ;;  %p101_p0 = scmp.ne.s32.totalorder %s479_s14, %s475_s13 }
   0x6   : > { %p89_p1 = scmp.eq.s32.totalorder %s88_s20, 0  ;;  %p102_p2 = scmp.eq.s32.totalorder %s529_s16, 1 }
   0x7   : > { %p107_p3 = scmp.ne.s32.totalorder %s475_s13, %s471_s12  ;;  %p108_p4 = scmp.eq.s32.totalorder %s353_s17, 1 }
   0x8   : > { %s544_s21 = scalar_select %p89_p1, %s479_s14, %s91_s19  }
   0x9   : > { %p546_p5 = por %p102_p2, %p101_p0  ;;  %p550_p6 = por %p108_p4, %p107_p3 }
   0xa   : > { %p356_p7 = scmp.ge.s32.totalorder %s483_s15, 1  ;;  %p139_p8 = scmp.lt.s32.totalorder %s483_s15, 3 }
   0xc   : > { %p140_p9 = pnand %p356_p7, %p139_p8 }
   0xd   : > { %p162_p10 = scmp.lt.s32.totalorder (!%p140_p9), %s529_s16, 1  ;;  %s486_s6 = smov (!%p140_p9), 127  }
   0xe   : > { %143 = sbr.rel (%p140_p9) target bundleno = 386 (0x182), region = 32  ;;  %s159_s11 = sand.u32 (!%p140_p9), 1, %s475_s13  }
   0xf   : > { %s357_s17 = sshll.u32 (!%p140_p9), %s159_s11, 3  ;;  %s363_s19 = sshll.u32 (!%p140_p9), %s529_s16, 7 }
  0x10   : > { %s161_s20 = scalar_lea.vmem (!%p140_p9), [#allocation2], %s357_s17  ;;  %s292_s27 = scalar_lea.hbm (!%p140_p9), %s612_s3, %s363_s19 }
  0x11   : > { %s294_s24 = sshll.u32 (!%p140_p9), %s161_s20, 4  ;;  %s487_s30 = smov (!%p140_p9), [#allocation2]   ;;  %s295_s24 = int_to_ptr.vmem [resolvable:$true] %s294_s24 }
  0x13   : > { %v166_v0 = vld [vmem:[%s610_s1] sm:$0xff]  ;;  %vm188_vm0 = vcmask 64512   ;;  %s163_s28 = scalar_select %p162_p10, %s529_s16, 1  ;;  %v485_v2 = vmov 0   ;;  %v169_v5 = vld [vmem:[%s611_s2 + $0x8] sm:$0xff]  ;;  %vm176_vm1 = vcmask 1043456  }
  0x14   : > { %371 = vmatprep.mubr.msk.f32.mxu0 %vm188_vm0, %v166_v0  ;;  %v168_v1 = vld [vmem:[%s611_s2] sm:$0xff]  ;;  %415 = vset.pattern.permute.xlu0 %v485_v2  ;;  %v167_v8 = vld [vmem:[%s610_s1 + $0x8] sm:$0xff]  ;;  %vm278_vm2 = vcmask 121856   ;;  %s427_s16 = sshll.u32 %s487_s30, 4  ;;  %s428_s16 = int_to_ptr.vmem [resolvable:$false] %s427_s16 }
  0x15   : > { %416 = vset.pattern.permute.xlu1 %v485_v2  ;;  %s358_s29 = sshll.u32 %s163_s28, 2  ;;  %s281_s28 = scalar_lea.sflag [#allocation3], %s159_s11 }
  0x16   : > { %180 = vperm.xlu1 %416, %v168_v1   ;;  %s165_s5 = scalar_lea.vmem %s609_s0, %s358_s29  ;;  %s423_s29 = scalar_lea.vmem %s295_s24, 128 }
  0x17   : > { %v170_v3 = vld [vmem:[%s165_s5] sm:$0xf]  ;;  %p424_p11 = scmp.ne.s32.totalorder %s295_s24, %s423_s29  ;;  %s429_s4 = scalar_lea.vmem %s428_s16, 256 }
  0x18   : > { %v172_v4 = vrot.slane %v170_v3, 4  ;;  %p430_p0 = scmp.lt.s32.totalorder %s295_s24, %s428_s16  ;;  %p431_p1 = scmp.lt.s32.totalorder %s429_s4, %s423_s29 }
  0x19   : > { %p425_p12 = pnand %p424_p11, %p546_p5 }
  0x1a   : > { %173 = vrot.lane.b32.xlu0 %v172_v4, %s486_s6  ;;  %p432_p2 = por %p431_p1, %p430_p0 }
  0x1b   : > { %p426_p13 = pneg %p425_p12 }
  0x1d   : > { %p433_p3 = pnand %p432_p2, %p426_p13 }
  0x1e   : > { %185 = vperm.xlu0 %415, %v169_v5  }
  0x8c   : > { %v174_v6 = vpop.permute.xlu0 %173 }
  0x8d   : > { %v177_v7 = vsel %vm176_vm1, %v170_v3, %v174_v6 }
  0x8e   : > { %369 = vmatprep.subr.mxu0 %v177_v7 }
  0x8f   : > { %370 = vmatpush3.msra.mxu0 %v177_v7 }
  0x90   : > { %372 = vmatmul.mubr.msk.f32.vlgmr.msra.gmra.mxu0 %vm188_vm0, %v167_v8 }
  0x91   : > { %v181_v13 = vpop.permute.xlu1 %180 }
  0x99   : > { %v186_v9 = vpop.permute.xlu0 %185 }
 0x150   : > { %v373_v10 = vpop.f32.mrf.mxu0 }
 0x151   : > { %v267_v11 = vadd.f32 %v373_v10, %v186_v9 }
 0x152   : > { %v261_v14 = vpop.f32.mrf.mxu0 }
 0x153   : > { %v361_v12 = vmul.f32 -1.442695, %v267_v11  ;;  %v262_v15 = vadd.f32 %v261_v14, %v181_v13 }
 0x155   : > { %417 = vpow2.f32 %v361_v12 }
 0x156   : > { %419 = vtanh.f32 %v262_v15 }
 0x162   : > { %v418_v16 = vpop.eup %417 }
 0x163   : > { %v274_v17 = vadd.f32 1.0, %v418_v16  ;;  %v420_v18 = vpop.eup %419 }
 0x165   : > { %421 = vrcp.f32 %v274_v17 }
 0x172   : > { %v422_v19 = vpop.eup %421 }
 0x173   : > { %v277_v20 = vmul.f32 %v422_v19, %v420_v18 }
 0x175   : > { %279 = vst.msk [vmem:[%s161_s20] sm:$0xff] %vm278_vm2, %v277_v20 }
 0x176   : > { %436 = shalt.err (!%p433_p3)
}
 0x177   : > { %s437_s5 = scalar_lea.hbm %s292_s27, 128  ;;  %s441_s8 = scalar_lea.hbm %s612_s3, 256 }
 0x178   : > { %p438_p4 = scmp.ne.s32.totalorder %s292_s27, %s437_s5  ;;  %p442_p9 = scmp.lt.s32.totalorder %s292_s27, %s612_s3 }
 0x179   : > { %p443_p10 = scmp.lt.s32.totalorder %s441_s8, %s437_s5 }
 0x17a   : > { %p439_p7 = pnand %p438_p4, %p546_p5 }
 0x17b   : > { %p444_p11 = por %p443_p10, %p442_p9 }
 0x17c   : > { %p440_p8 = pneg %p439_p7 }
 0x17e   : > { %p445_p12 = pnand %p444_p11, %p440_p8 }
 0x180   : > { %448 = shalt.err (!%p445_p12)
}
 0x181   : > { %374 = dma.vmem_to_hbm [thread:$0]  (%p546_p5), %s295_s24, 128, %s292_s27, %s281_s28  }
 0x182 PF: > { %p380_p13 = scmp.ge.s32.totalorder %s483_s15, 2  ;;  %s306_s11 = sand.u32 1, %s471_s12  }
 0x183   : > { %s307_s17 = scalar_lea.sflag [#allocation3], %s306_s11 }
 0x184   : > { %p377_p0 = pnand %p380_p13, %p550_p6 }
 0x186   : > { %p378_p1 = pneg %p377_p0 }
 0x188   : > { %466 = dma.done.wait (%p378_p1), %s307_s17, 128  }
 0x189   : > { %468 = vsyncadd (%p378_p1), %s307_s17, 4294967168  ;;  %p13_p2 = scmp.ge.s32.totalorder %s533_s18, 4   ;;  %s615_s12 = smov %s475_s13 }
 0x18a   : > { %s616_s13 = smov %s479_s14  ;;  %s617_s14 = smov %s544_s21 }
 0x18b   : > { %s618_s15 = smov %s533_s18  ;;  %15 = sbr.rel (!%p13_p2) target bundleno = 3 (0x3), region = 67 }
 0x190   :  { %312 = vsyncpa [#allocation3], 1 }
 0x191   :  { %314 = vsyncpa [#allocation3 + $0x1], 1 }

</bundles_post_ra>
